<compile_context>
chip_gen: v5e
topology: v5e:2x2
jax: 0.10.0
libtpu: 0.0.40
codegen_flags: <defaults>
</compile_context>

<pallas_src>
import itertools

import numpy as np
import jax
import jax.numpy as jnp
from jax.experimental import pallas as pl
from jax.experimental.pallas import tpu as pltpu

# ---- matcher hyper-parameters (from HungarianMatcher.__init__ defaults) ----
COST_CLASS = 1.0
COST_BBOX = 8.0
# COST_GIOU = 3.0  -- giou path unreachable (external ops undefined), see TODO below
ALPHA = 0.25
GAMMA = 2.0          # kernel hard-codes the gamma=2 squaring; keep in sync
EPS = 1e-8           # only used by the plain-JAX validation reference

BOX_DIM = 7          # 3-D boxes: x, y, z, w, l, h, r
TGT_PAD = 128        # hard cap on total #targets per call (checked in wrapper)
MAX_TILE = 2048      # rows per grid step at scale (amortizes per-step overhead)

assert GAMMA == 2.0, "kernel implements the focal modulating factor as squaring"


def matcher_cost_kernel(logits_ref, boxes_ref, onehot_ref, tboxes_t_ref, c_ref):
    """C_tile = L1(COST_BBOX*boxes, COST_BBOX*tgt_boxes) + COST_CLASS * focal_class_cost."""
    # --- classification (focal-style) cost, logit-domain, 3 transcendentals ---
    x = logits_ref[...].astype(jnp.float32)                     # (tile, NC)
    # stable softplus(-x) = -log(sigmoid(x))          [1 exp + 1 log]
    sp_neg = jnp.maximum(-x, 0.0) + jnp.log(1.0 + jnp.exp(-jnp.abs(x)))
    # softplus(x) = x + softplus(-x) = -log(1 - sigmoid(x))   [exact identity, 0 EUP]
    sp_pos = x + sp_neg
    # sigmoid(x) = exp(-softplus(-x))                 [1 exp]
    p = jnp.exp(-sp_neg)
    one_m_p = 1.0 - p
    pos_cost = (ALPHA * (one_m_p * one_m_p)) * sp_neg
    neg_cost = ((1.0 - ALPHA) * (p * p)) * sp_pos
    diff = pos_cost - neg_cost                                  # (tile, NC)

    # gather per-target class columns via one-hot matmul on the MXU
    # (one-hot is grid-invariant, built once in the wrapper; padded targets
    #  carry id = -1 so their columns are all-zero)
    cost_class = jnp.dot(diff, onehot_ref[...],
                         preferred_element_type=jnp.float32)    # (tile, TGT_PAD)
    if COST_CLASS != 1.0:   # statically folded away for the default weights
        cost_class = COST_CLASS * cost_class

    # --- L1 (cdist p=1) bbox cost; COST_BBOX folded into the tiny operands ---
    # (target side pre-scaled in the wrapper; pred side is only (tile, 7))
    b1 = boxes_ref[...].astype(jnp.float32) * COST_BBOX         # (tile, BOX_DIM)
    b2t = tboxes_t_ref[...]                                     # (BOX_DIM, TGT_PAD), pre-scaled
    # Unrolled per-dim loop kept on purpose: the 3-D broadcast form would
    # materialize a (tile, TGT_PAD, 7) temporary and thrash VMEM/vregs.
    cost_bbox = jnp.abs(b1[:, 0:1] - b2t[0:1, :])
    for d in range(1, BOX_DIM):
        cost_bbox = cost_bbox + jnp.abs(b1[:, d:d + 1] - b2t[d:d + 1, :])

    c_ref[...] = cost_bbox + cost_class


def _round_up(v, m):
    return ((v + m - 1) // m) * m


def compute_cost_matrix_padded(pred_logits, pred_boxes, tgt_ids, tgt_boxes):
    """Run the tiled Pallas kernel; returns the full (n_pad, TGT_PAD) device array.

    The caller trims the padding on host (keeps the device output lane-dense).
    """
    bs, nq, num_classes = pred_logits.shape
    n = bs * nq
    nt = int(tgt_ids.shape[0])

    if nt > TGT_PAD:
        raise ValueError(f"total targets={nt} exceeds TGT_PAD={TGT_PAD}; "
                         "tile the target axis to support more")

    # --- tile / grid: big tiles, but always >= 2 steps so v7x megacore splits ---
    n_rounded = _round_up(n, 8)
    if n_rounded <= 2 * MAX_TILE:
        grid_steps = 2 if n_rounded >= 16 else 1
        tile = _round_up(pl.cdiv(n_rounded, grid_steps), 8)
    else:
        tile = MAX_TILE
        grid_steps = pl.cdiv(n_rounded, tile)
    n_pad = tile * grid_steps

    # logits / boxes: keep native dtype and native class width (no padded f32
    # copy of the biggest tensor); pad rows only if the tile doesn't divide n.
    logits = pred_logits.reshape(n, num_classes)
    boxes = pred_boxes.reshape(n, BOX_DIM)
    if n_pad != n:
        logits = jnp.pad(logits, ((0, n_pad - n), (0, 0)))
        boxes = jnp.pad(boxes, ((0, n_pad - n), (0, 0)))

    # grid-invariant operands, built once in the wrapper (hoisted out of the kernel)
    tgt_ids_pad = jnp.pad(tgt_ids.astype(jnp.int32), (0, TGT_PAD - nt),
                          constant_values=-1)
    onehot_t = (jnp.arange(num_classes, dtype=jnp.int32)[:, None]
                == tgt_ids_pad[None, :]).astype(jnp.float32)        # (NC, TGT_PAD)
    tboxes_t = jnp.pad(tgt_boxes.astype(jnp.float32).T * COST_BBOX,
                       ((0, 0), (0, TGT_PAD - nt)))                 # (BOX_DIM, TGT_PAD)

    c_full = pl.pallas_call(
        matcher_cost_kernel,
        out_shape=jax.ShapeDtypeStruct((n_pad, TGT_PAD), jnp.float32),
        grid=(grid_steps,),
        in_specs=[
            # per-tile query logits / boxes (last dim == full array dim)
            pl.BlockSpec((tile, num_classes), lambda i: (i, 0)),
            pl.BlockSpec((tile, BOX_DIM), lambda i: (i, 0)),
            # grid-invariant class->target one-hot (stays resident in VMEM)
            pl.BlockSpec((num_classes, TGT_PAD), lambda i: (0, 0)),
            # grid-invariant pre-scaled target boxes (box-dim major)
            pl.BlockSpec((BOX_DIM, TGT_PAD), lambda i: (0, 0)),
        ],
        out_specs=pl.BlockSpec((tile, TGT_PAD), lambda i: (i, 0)),
        compiler_params=pltpu.CompilerParams(
            dimension_semantics=("parallel",)),
    )(logits, boxes, onehot_t, tboxes_t)
    return c_full


def compute_cost_matrix(pred_logits, pred_boxes, tgt_ids, tgt_boxes):
    """Convenience: full kernel run + host-side trim to (bs, nq, nt) numpy."""
    bs, nq, _ = pred_logits.shape
    n = bs * nq
    nt = int(tgt_ids.shape[0])
    c_full = compute_cost_matrix_padded(pred_logits, pred_boxes, tgt_ids, tgt_boxes)
    c_host = np.asarray(jax.block_until_ready(c_full))
    # trim padding on host: the device output stays a lane-dense (n_pad, 128) block
    return c_host[:n, :nt].reshape(bs, nq, nt)


def _linear_sum_assignment_small(cost):
    """Exact assignment for tiny cost matrices (brute force over permutations).

    Matches scipy.optimize.linear_sum_assignment semantics for the sizes used here.
    """
    # TODO(synk): the Hungarian / linear_sum_assignment step is sequential,
    # data-dependent control flow with no clean Pallas equivalent; done on host.
    cost = np.asarray(cost)
    r, c = cost.shape
    best_cost, best = np.inf, None
    if r >= c:
        for rows in itertools.permutations(range(r), c):
            total = cost[list(rows), list(range(c))].sum()
            if total < best_cost:
                best_cost, best = total, (np.array(rows), np.arange(c))
    else:
        for cols in itertools.permutations(range(c), r):
            total = cost[np.arange(r), list(cols)].sum()
            if total < best_cost:
                best_cost, best = total, (np.arange(r), np.array(cols))
    order = np.argsort(best[0])
    return best[0][order].astype(np.int64), best[1][order].astype(np.int64)


def hungarian_matcher_forward(outputs, targets):
    """JAX/Pallas equivalent of HungarianMatcher.forward (final fallback branch)."""
    # TODO(synk): cost_giou path uses undefined external ops (bbox_overlaps_3d /
    # boxes_iou_bev), so as in the reference it is unreachable and omitted.
    pred_logits = outputs["pred_logits"]
    pred_boxes = outputs["pred_boxes"]
    tgt_ids = jnp.concatenate([t["labels"] for t in targets])
    tgt_boxes = jnp.concatenate([t["boxes"] for t in targets])

    C = compute_cost_matrix(pred_logits, pred_boxes, tgt_ids, tgt_boxes)

    sizes = [int(t["boxes"].shape[0]) for t in targets]
    indices = []
    off = 0
    for i, sz in enumerate(sizes):
        indices.append(_linear_sum_assignment_small(C[i, :, off:off + sz]))
        off += sz
    return indices, C


# TODO(synk): Criterion's loss_boxes depends on the undefined external op
# cal_diou_3d, and the remaining loss terms are tiny index/gather glue; only the
# matcher cost-matrix (the parallel numeric hot path) is implemented in Pallas.


def _reference_cost(pred_logits, pred_boxes, tgt_ids, tgt_boxes):
    """Plain-JAX reference of the cost matrix, mirroring the PyTorch numerics."""
    bs, nq, nc = pred_logits.shape
    out_prob = jax.nn.sigmoid(pred_logits.reshape(-1, nc).astype(jnp.float32))
    out_bbox = pred_boxes.reshape(-1, BOX_DIM).astype(jnp.float32)
    neg = (1 - ALPHA) * out_prob ** GAMMA * (-jnp.log(1 - out_prob + EPS))
    pos = ALPHA * (1 - out_prob) ** GAMMA * (-jnp.log(out_prob + EPS))
    cost_class = pos[:, tgt_ids] - neg[:, tgt_ids]
    cost_bbox = jnp.abs(out_bbox[:, None, :] - tgt_boxes[None, :, :]).sum(-1)
    C = COST_BBOX * cost_bbox + COST_CLASS * cost_class
    return C.reshape(bs, nq, -1)


if __name__ == "__main__":
    key = jax.random.PRNGKey(0)
    bs, num_queries, num_classes = 2, 8, 4
    k1, k2, k3, k4, k5, k6 = jax.random.split(key, 6)

    outputs = {
        "pred_logits": jax.random.normal(k1, (bs, num_queries, num_classes), jnp.float32),
        "pred_boxes": jax.random.normal(k2, (bs, num_queries, BOX_DIM), jnp.float32),
    }
    targets = [
        {"labels": jax.random.randint(k3, (3,), 0, num_classes),
         "boxes": jax.random.normal(k4, (3, BOX_DIM), jnp.float32)},
        {"labels": jax.random.randint(k5, (4,), 0, num_classes),
         "boxes": jax.random.normal(k6, (4, BOX_DIM), jnp.float32)},
    ]

    indices, C_kernel = hungarian_matcher_forward(outputs, targets)

    # validate the Pallas-computed cost matrix against a plain-JAX reference
    tgt_ids = jnp.concatenate([t["labels"] for t in targets])
    tgt_boxes = jnp.concatenate([t["boxes"] for t in targets])
    C_ref = np.asarray(_reference_cost(outputs["pred_logits"], outputs["pred_boxes"],
                                       tgt_ids, tgt_boxes))
    np.testing.assert_allclose(C_kernel, C_ref, rtol=1e-4, atol=1e-4)

    for i, j in indices:
        assert len(i) == len(j) == min(num_queries, len(i))

    print("KERNEL_OK")
</pallas_src>

<mosaic_0001>
module attributes {stable_mosaic.version = 11 : i64} {
  func.func @matcher_cost_kernel(%arg0: i32, %arg1: memref<8x4xf32, #tpu.memory_space<vmem>>, %arg2: memref<8x7xf32, #tpu.memory_space<vmem>>, %arg3: memref<4x128xf32, #tpu.memory_space<vmem>>, %arg4: memref<7x128xf32, #tpu.memory_space<vmem>>, %arg5: memref<8x128xf32, #tpu.memory_space<vmem>>) attributes {dimension_semantics = [#tpu.dimension_semantics<parallel>], iteration_bounds = array<i64: 2>, scalar_prefetch = 0 : i64, scratch_operands = 0 : i64, tpu.core_type = #tpu.core_type<tc>, window_params = [{transform_indices = @transform_0, window_bounds = array<i64: 8, 4>}, {transform_indices = @transform_1, window_bounds = array<i64: 8, 7>}, {pipeline_mode = #tpu.pipeline_mode<synchronous>, transform_indices = @transform_2, window_bounds = array<i64: 4, 128>}, {pipeline_mode = #tpu.pipeline_mode<synchronous>, transform_indices = @transform_3, window_bounds = array<i64: 7, 128>}, {transform_indices = @transform_4, window_bounds = array<i64: 8, 128>}]} {
    %c0 = arith.constant 0 : index
    %c0_0 = arith.constant 0 : index
    %0 = vector.load %arg1[%c0, %c0_0] : memref<8x4xf32, #tpu.memory_space<vmem>>, vector<8x4xf32>
    %cst = arith.constant 0.000000e+00 : f32
    %1 = vector.broadcast %cst : f32 to vector<8x4xf32>
    %2 = arith.subf %1, %0 : vector<8x4xf32>
    %cst_1 = arith.constant 0.000000e+00 : f32
    %3 = vector.broadcast %cst_1 : f32 to vector<8x4xf32>
    %4 = arith.maximumf %2, %3 : vector<8x4xf32>
    %5 = math.absf %0 : vector<8x4xf32>
    %cst_2 = arith.constant 0.000000e+00 : f32
    %6 = vector.broadcast %cst_2 : f32 to vector<8x4xf32>
    %7 = arith.subf %6, %5 : vector<8x4xf32>
    %8 = math.exp %7 : vector<8x4xf32>
    %cst_3 = arith.constant 1.000000e+00 : f32
    %9 = vector.broadcast %cst_3 : f32 to vector<8x4xf32>
    %10 = arith.addf %9, %8 : vector<8x4xf32>
    %11 = math.log %10 : vector<8x4xf32>
    %12 = arith.addf %4, %11 : vector<8x4xf32>
    %13 = arith.addf %0, %12 : vector<8x4xf32>
    %cst_4 = arith.constant 0.000000e+00 : f32
    %14 = vector.broadcast %cst_4 : f32 to vector<8x4xf32>
    %15 = arith.subf %14, %12 : vector<8x4xf32>
    %16 = math.exp %15 : vector<8x4xf32>
    %cst_5 = arith.constant 1.000000e+00 : f32
    %17 = vector.broadcast %cst_5 : f32 to vector<8x4xf32>
    %18 = arith.subf %17, %16 : vector<8x4xf32>
    %19 = arith.mulf %18, %18 : vector<8x4xf32>
    %cst_6 = arith.constant 2.500000e-01 : f32
    %20 = vector.broadcast %cst_6 : f32 to vector<8x4xf32>
    %21 = arith.mulf %20, %19 : vector<8x4xf32>
    %22 = arith.mulf %21, %12 : vector<8x4xf32>
    %23 = arith.mulf %16, %16 : vector<8x4xf32>
    %cst_7 = arith.constant 7.500000e-01 : f32
    %24 = vector.broadcast %cst_7 : f32 to vector<8x4xf32>
    %25 = arith.mulf %24, %23 : vector<8x4xf32>
    %26 = arith.mulf %25, %13 : vector<8x4xf32>
    %27 = arith.subf %22, %26 : vector<8x4xf32>
    %c0_8 = arith.constant 0 : index
    %c0_9 = arith.constant 0 : index
    %28 = vector.load %arg3[%c0_8, %c0_9] : memref<4x128xf32, #tpu.memory_space<vmem>>, vector<4x128xf32>
    %cst_10 = arith.constant dense<0.000000e+00> : vector<8x128xf32>
    %29 = tpu.matmul %27, %28, %cst_10 {dimension_numbers = #tpu.dot_dimension_numbers<[1], [0], [0], [1], [0, 0, 1, 1], [], []>} : vector<8x4xf32>, vector<4x128xf32>, vector<8x128xf32> -> vector<8x128xf32>
    %c0_11 = arith.constant 0 : index
    %c0_12 = arith.constant 0 : index
    %30 = vector.load %arg2[%c0_11, %c0_12] : memref<8x7xf32, #tpu.memory_space<vmem>>, vector<8x7xf32>
    %cst_13 = arith.constant 8.000000e+00 : f32
    %31 = vector.broadcast %cst_13 : f32 to vector<8x7xf32>
    %32 = arith.mulf %30, %31 : vector<8x7xf32>
    %c0_14 = arith.constant 0 : index
    %c0_15 = arith.constant 0 : index
    %33 = vector.load %arg4[%c0_14, %c0_15] : memref<7x128xf32, #tpu.memory_space<vmem>>, vector<7x128xf32>
    %34 = vector.extract_strided_slice %32 {offsets = [0, 0], sizes = [8, 1], strides = [1, 1]} : vector<8x7xf32> to vector<8x1xf32>
    %35 = vector.extract_strided_slice %33 {offsets = [0, 0], sizes = [1, 128], strides = [1, 1]} : vector<7x128xf32> to vector<1x128xf32>
    %36 = vector.broadcast %34 : vector<8x1xf32> to vector<8x128xf32>
    %37 = vector.broadcast %35 : vector<1x128xf32> to vector<8x128xf32>
    %38 = arith.subf %36, %37 : vector<8x128xf32>
    %39 = math.absf %38 : vector<8x128xf32>
    %40 = vector.extract_strided_slice %32 {offsets = [0, 1], sizes = [8, 1], strides = [1, 1]} : vector<8x7xf32> to vector<8x1xf32>
    %41 = vector.extract_strided_slice %33 {offsets = [1, 0], sizes = [1, 128], strides = [1, 1]} : vector<7x128xf32> to vector<1x128xf32>
    %42 = vector.broadcast %40 : vector<8x1xf32> to vector<8x128xf32>
    %43 = vector.broadcast %41 : vector<1x128xf32> to vector<8x128xf32>
    %44 = arith.subf %42, %43 : vector<8x128xf32>
    %45 = math.absf %44 : vector<8x128xf32>
    %46 = arith.addf %39, %45 : vector<8x128xf32>
    %47 = vector.extract_strided_slice %32 {offsets = [0, 2], sizes = [8, 1], strides = [1, 1]} : vector<8x7xf32> to vector<8x1xf32>
    %48 = vector.extract_strided_slice %33 {offsets = [2, 0], sizes = [1, 128], strides = [1, 1]} : vector<7x128xf32> to vector<1x128xf32>
    %49 = vector.broadcast %47 : vector<8x1xf32> to vector<8x128xf32>
    %50 = vector.broadcast %48 : vector<1x128xf32> to vector<8x128xf32>
    %51 = arith.subf %49, %50 : vector<8x128xf32>
    %52 = math.absf %51 : vector<8x128xf32>
    %53 = arith.addf %46, %52 : vector<8x128xf32>
    %54 = vector.extract_strided_slice %32 {offsets = [0, 3], sizes = [8, 1], strides = [1, 1]} : vector<8x7xf32> to vector<8x1xf32>
    %55 = vector.extract_strided_slice %33 {offsets = [3, 0], sizes = [1, 128], strides = [1, 1]} : vector<7x128xf32> to vector<1x128xf32>
    %56 = vector.broadcast %54 : vector<8x1xf32> to vector<8x128xf32>
    %57 = vector.broadcast %55 : vector<1x128xf32> to vector<8x128xf32>
    %58 = arith.subf %56, %57 : vector<8x128xf32>
    %59 = math.absf %58 : vector<8x128xf32>
    %60 = arith.addf %53, %59 : vector<8x128xf32>
    %61 = vector.extract_strided_slice %32 {offsets = [0, 4], sizes = [8, 1], strides = [1, 1]} : vector<8x7xf32> to vector<8x1xf32>
    %62 = vector.extract_strided_slice %33 {offsets = [4, 0], sizes = [1, 128], strides = [1, 1]} : vector<7x128xf32> to vector<1x128xf32>
    %63 = vector.broadcast %61 : vector<8x1xf32> to vector<8x128xf32>
    %64 = vector.broadcast %62 : vector<1x128xf32> to vector<8x128xf32>
    %65 = arith.subf %63, %64 : vector<8x128xf32>
    %66 = math.absf %65 : vector<8x128xf32>
    %67 = arith.addf %60, %66 : vector<8x128xf32>
    %68 = vector.extract_strided_slice %32 {offsets = [0, 5], sizes = [8, 1], strides = [1, 1]} : vector<8x7xf32> to vector<8x1xf32>
    %69 = vector.extract_strided_slice %33 {offsets = [5, 0], sizes = [1, 128], strides = [1, 1]} : vector<7x128xf32> to vector<1x128xf32>
    %70 = vector.broadcast %68 : vector<8x1xf32> to vector<8x128xf32>
    %71 = vector.broadcast %69 : vector<1x128xf32> to vector<8x128xf32>
    %72 = arith.subf %70, %71 : vector<8x128xf32>
    %73 = math.absf %72 : vector<8x128xf32>
    %74 = arith.addf %67, %73 : vector<8x128xf32>
    %75 = vector.extract_strided_slice %32 {offsets = [0, 6], sizes = [8, 1], strides = [1, 1]} : vector<8x7xf32> to vector<8x1xf32>
    %76 = vector.extract_strided_slice %33 {offsets = [6, 0], sizes = [1, 128], strides = [1, 1]} : vector<7x128xf32> to vector<1x128xf32>
    %77 = vector.broadcast %75 : vector<8x1xf32> to vector<8x128xf32>
    %78 = vector.broadcast %76 : vector<1x128xf32> to vector<8x128xf32>
    %79 = arith.subf %77, %78 : vector<8x128xf32>
    %80 = math.absf %79 : vector<8x128xf32>
    %81 = arith.addf %74, %80 : vector<8x128xf32>
    %82 = arith.addf %81, %29 : vector<8x128xf32>
    %c0_16 = arith.constant 0 : index
    %c0_17 = arith.constant 0 : index
    %83 = vector.load %arg5[%c0_16, %c0_17] : memref<8x128xf32, #tpu.memory_space<vmem>>, vector<8x128xf32>
    tpu.vector_store %arg5[%c0_16, %c0_17], %82 {strides = array<i32>} : memref<8x128xf32, #tpu.memory_space<vmem>>, vector<8x128xf32>,
    return
  }
  func.func @transform_0(%arg0: i32) -> (i32, i32) {
    %c0_i32 = arith.constant 0 : i32
    %c0_i32_0 = arith.constant 0 : i32
    return %arg0, %c0_i32 : i32, i32
  }
  func.func @transform_1(%arg0: i32) -> (i32, i32) {
    %c0_i32 = arith.constant 0 : i32
    %c0_i32_0 = arith.constant 0 : i32
    return %arg0, %c0_i32 : i32, i32
  }
  func.func @transform_2(%arg0: i32) -> (i32, i32) {
    %c0_i32 = arith.constant 0 : i32
    %c0_i32_0 = arith.constant 0 : i32
    %c0_i32_1 = arith.constant 0 : i32
    return %c0_i32, %c0_i32_0 : i32, i32
  }
  func.func @transform_3(%arg0: i32) -> (i32, i32) {
    %c0_i32 = arith.constant 0 : i32
    %c0_i32_0 = arith.constant 0 : i32
    %c0_i32_1 = arith.constant 0 : i32
    return %c0_i32, %c0_i32_0 : i32, i32
  }
  func.func @transform_4(%arg0: i32) -> (i32, i32) {
    %c0_i32 = arith.constant 0 : i32
    %c0_i32_0 = arith.constant 0 : i32
    return %arg0, %c0_i32 : i32, i32
  }
}

</mosaic_0001>

<bundles_post_ra>
// kernel: tpu_custom_call.1
= control target key start
LH: loop header
LB: loop body
LE: loop exit
PB: predicated region body
PF: predicated region fallthrough
CT: control target
= control target key end

     0   :  { %9 = vsyncpa [#allocation3], 0  ;;  %s673_s0 = inlined_call_operand.vmem [shape: f32[16,4], index: 0, kind: input, shape index: {}]   ;;  %s674_s1 = inlined_call_operand.vmem [shape: f32[16,7], index: 1, kind: input, shape index: {}]   ;;  %s675_s2 = inlined_call_operand.vmem [shape: f32[4,128], index: 2, kind: input, shape index: {}]   ;;  %s676_s3 = inlined_call_operand.vmem [shape: f32[7,128], index: 3, kind: input, shape index: {}]   ;;  %s677_s4 = inlined_call_operand.hbm [shape: f32[16,128], index: 4, kind: output, shape index: {}]  }
   0x1   :  { %11 = vsyncpa [#allocation3 + $0x1], 0  ;;  %s579_s15 = smov 0   ;;  %s581_s16 = smov 0  }
   0x2   :  { %s583_s17 = smov 0   ;;  %s585_s18 = smov 0  }
   0x3 LB: > { %s600_s19 = sadd.s32 4294967295, %s545_s18   ;;  %s410_s20 = sadd.s32 4294967294, %s545_s18   ;;  %s545_s18 = sphi %s585_s18, %s683_s18   ;;  %s541_s17 = sphi %s583_s17, %s682_s17   ;;  %s537_s16 = sphi %s581_s16, %s681_s16   ;;  %s533_s15 = sphi %s579_s15, %s680_s15  }
   0x4   : > { %s604_s21 = sadd.s32 1, %s545_s18   ;;  %s118_s22 = sadd.s32 1, %s541_s17 }
   0x5   : > { %s115_s23 = ssub.s32 %s545_s18, %s604_s21  ;;  %p128_p0 = scmp.ne.s32.totalorder %s541_s17, %s537_s16 }
   0x6   : > { %p116_p1 = scmp.eq.s32.totalorder %s115_s23, 0  ;;  %p129_p2 = scmp.eq.s32.totalorder %s600_s19, 1 }
   0x7   : > { %p134_p3 = scmp.ne.s32.totalorder %s537_s16, %s533_s15  ;;  %p135_p4 = scmp.eq.s32.totalorder %s410_s20, 1 }
   0x8   : > { %s615_s24 = scalar_select %p116_p1, %s541_s17, %s118_s22  }
   0x9   : > { %p617_p5 = por %p129_p2, %p128_p0  ;;  %p621_p6 = por %p135_p4, %p134_p3 }
   0xa   : > { %p413_p7 = scmp.ge.s32.totalorder %s545_s18, 1  ;;  %p173_p8 = scmp.lt.s32.totalorder %s545_s18, 3 }
   0xc   : > { %p174_p9 = pnand %p413_p7, %p173_p8 }
   0xd   : > { %p202_p10 = scmp.lt.s32.totalorder (!%p174_p9), %s600_s19, 1  ;;  %s199_s13 = sand.u32 (!%p174_p9), 1, %s537_s16  }
   0xe   : > { %177 = sbr.rel (%p174_p9) target bundleno = 203 (0xcb), region = 36  ;;  %s414_s14 = sshll.u32 (!%p174_p9), %s199_s13, 3 }
   0xf   : > { %s420_s20 = sshll.u32 (!%p174_p9), %s600_s19, 3  ;;  %s201_s28 = scalar_lea.vmem (!%p174_p9), [#allocation2], %s414_s14 }
  0x10   : > { %s334_s27 = scalar_lea.hbm (!%p174_p9), %s677_s4, %s420_s20  ;;  %s324_s5 = scalar_lea.sflag (!%p174_p9), [#allocation3], %s199_s13 }
  0x11   : > { %s503_s9 = scalar_lea.hbm (!%p174_p9), %s677_s4, 16 }
  0x13   : > { %v547_v0 = vmov 0   ;;  %v548_v1 = vmov 2   ;;  %v233_v2 = vld [vmem:[%s675_s2] sm:$0xf]  ;;  %vm238_vm0 = vcmask 1043456   ;;  %s203_s29 = scalar_select %p202_p10, %s600_s19, 1 }
  0x14   : > { %469 = vset.pattern.permute.xlu0 %v547_v0  ;;  %471 = vset.pattern.permute.xlu1 %v548_v1  ;;  %v549_v9 = vmov 1   ;;  %v550_v10 = vmov 3   ;;  %v551_v14 = vmov 4   ;;  %v552_v15 = vmov 6   ;;  %v264_v34 = vld [vmem:[%s676_s3] sm:$0x7f] }
  0x15   : > { %417 = vmatpush.msk.msra.mxu0 %vm238_vm0, %v233_v2  ;;  %s415_s30 = sshll.u32 %s203_s29, 3  ;;  %473 = vset.pattern.permute.xlu2 %v551_v14  ;;  %v553_v20 = vmov 5   ;;  %vm234_vm1 = vcmask 31744   ;;  %v270_v35 = vperm.slane %v264_v34, 0  ;;  %v277_v36 = vperm.slane %v264_v34, 1  ;;  %s336_s29 = sshll.u32 %s201_s28, 4  ;;  %s337_s29 = int_to_ptr.vmem [resolvable:$true] %s336_s29 }
  0x16   : > { %s209_s7 = scalar_lea.vmem %s674_s1, %s415_s30  ;;  %s205_s10 = scalar_lea.vmem %s673_s0, %s415_s30  ;;  %v285_v40 = vperm.slane %v264_v34, 2  ;;  %v293_v46 = vperm.slane %v264_v34, 3  ;;  %v301_v49 = vperm.slane %v264_v34, 4  ;;  %v309_v55 = vperm.slane %v264_v34, 5 }
  0x17   : > { %v262_v3 = vld [vmem:[%s209_s7] sm:$0xff]  ;;  %v317_v60 = vperm.slane %v264_v34, 6  ;;  %s338_s30 = sshll.u32 %s334_s27, 4  ;;  %s339_s30 = int_to_ptr.hbm [resolvable:$true] %s338_s30 }
  0x18   : > { %v210_v4 = vld [vmem:[%s205_s10] sm:$0xff]  ;;  %v263_v5 = vmul.f32 8.0, %v262_v3  ;;  %s497_s6 = sshra.s32 %s339_s30, 4  ;;  %s498_s6 = int_to_ptr.hbm [resolvable:$true] %s497_s6 }
  0x19   : > { %v213_v6 = vand.u32 2147483647, %v210_v4  ;;  %v211_v13 = vsub.f32 0.0, %v210_v4  ;;  %s499_s19 = scalar_lea.hbm %s498_s6, 8  ;;  %p504_p0 = scmp.lt.s32.totalorder %s498_s6, %s677_s4 }
  0x1a   : > { %267 = vperm.xlu0 %469, %v263_v5   ;;  %282 = vperm.xlu1 %471, %v263_v5   ;;  %p500_p11 = scmp.ne.s32.totalorder %s498_s6, %s499_s19  ;;  %p505_p1 = scmp.lt.s32.totalorder %s503_s9, %s499_s19 }
  0x1b   : > { %v214_v7 = vsub.f32 0.0, %v213_v6  ;;  %298 = vperm.xlu2 %473, %v263_v5   ;;  %v212_v16 = vmax.f32 %v211_v13, 0.0 }
  0x1c   : > { %p501_p12 = pnand %p500_p11, %p617_p5  ;;  %p506_p2 = por %p505_p1, %p504_p0 }
  0x1d   : > { %v215_v8 = vmul.f32 1.442695, %v214_v7 }
  0x1e   : > { %p502_p13 = pneg %p501_p12 }
  0x1f   : > { %477 = vpow2.f32 %v215_v8 }
  0x20   : > { %p507_p3 = pnand %p506_p2, %p502_p13 }
  0x22   : > { %470 = vset.pattern.permute.xlu0 %v549_v9  ;;  %472 = vset.pattern.permute.xlu1 %v550_v10 }
  0x23   : > { %274 = vperm.xlu0 %470, %v263_v5   ;;  %290 = vperm.xlu1 %472, %v263_v5  }
  0x24   : > { %474 = vset.pattern.permute.xlu2 %v553_v20 }
  0x25   : > { %v478_v11 = vpop.eup %477  ;;  %306 = vperm.xlu2 %474, %v263_v5  }
  0x26   : > { %v217_v12 = vadd.f32 1.0, %v478_v11 }
  0x28   : > { %479 = vlog2.f32 %v217_v12 }
  0x2b   : > { %475 = vset.pattern.permute.xlu1 %v552_v15  ;;  %476 = vset.pattern.permute.xlu0 %v552_v15 }
  0x2c   : > { %314 = vperm.xlu1 %475, %v263_v5  }
  0x2e   : > { %v480_v17 = vpop.eup %479 }
  0x2f   : > { %v219_v18 = vmul.f32 0.6931472, %v480_v17 }
  0x31   : > { %v220_v19 = vadd.f32 %v219_v18, %v212_v16 }
  0x33   : > { %v222_v21 = vsub.f32 0.0, %v220_v19  ;;  %v221_v24 = vadd.f32 %v220_v19, %v210_v4 }
  0x35   : > { %v223_v22 = vmul.f32 1.442695, %v222_v21 }
  0x37   : > { %481 = vpow2.f32 %v223_v22 }
  0x3d   : > { %v482_v23 = vpop.eup %481 }
  0x3e   : > { %v225_v25 = vsub.f32 1.0, %v482_v23  ;;  %v229_v26 = vmul.f32 %v482_v23, %v482_v23 }
  0x40   : > { %v226_v27 = vmul.f32 %v225_v25, %v225_v25  ;;  %v230_v28 = vmul.f32 0.75, %v229_v26 }
  0x42   : > { %v227_v29 = vmul.f32 0.25, %v226_v27  ;;  %v231_v30 = vmul.f32 %v230_v28, %v221_v24 }
  0x44   : > { %v228_v31 = vmul.f32 %v227_v29, %v220_v19 }
  0x46   : > { %v232_v32 = vsub.f32 %v228_v31, %v231_v30 }
  0x48   : > { %418 = vmatmul.msk.f32.vlgmr.msra.gmra.mxu0 %vm234_vm1, %v232_v32 }
  0x75   : > { %v299_v42 = vpop.permute.xlu2 %298 }
  0x76   : > { %v302_v52 = vsub.f32 %v299_v42, %v301_v49 }
  0x78   : > { %v303_v57 = vand.u32 2147483647, %v302_v52 }
  0x7f   : > { %v307_v56 = vpop.permute.xlu2 %306 }
  0x80   : > { %v310_v59 = vsub.f32 %v307_v56, %v309_v55 }
  0x82   : > { %v311_v63 = vand.u32 2147483647, %v310_v59 }
  0x8c   : > { %v268_v33 = vpop.permute.xlu0 %267  ;;  %v283_v37 = vpop.permute.xlu1 %282 }
  0x8d   : > { %v271_v39 = vsub.f32 %v268_v33, %v270_v35  ;;  %v286_v44 = vsub.f32 %v283_v37, %v285_v40 }
  0x8f   : > { %v272_v43 = vand.u32 2147483647, %v271_v39  ;;  %v287_v48 = vand.u32 2147483647, %v286_v44 }
  0x95   : > { %v275_v38 = vpop.permute.xlu0 %274  ;;  %v291_v47 = vpop.permute.xlu1 %290 }
  0x96   : > { %v278_v41 = vsub.f32 %v275_v38, %v277_v36  ;;  %v294_v51 = vsub.f32 %v291_v47, %v293_v46 }
  0x98   : > { %v279_v45 = vand.u32 2147483647, %v278_v41  ;;  %v295_v54 = vand.u32 2147483647, %v294_v51 }
  0x9a   : > { %v280_v50 = vadd.f32 %v279_v45, %v272_v43 }
  0x9c   : > { %v288_v53 = vadd.f32 %v287_v48, %v280_v50 }
  0x9e   : > { %v296_v58 = vadd.f32 %v295_v54, %v288_v53  ;;  %v315_v61 = vpop.permute.xlu1 %314 }
  0x9f   : > { %v318_v0 = vsub.f32 %v315_v61, %v317_v60 }
  0xa0   : > { %v304_v62 = vadd.f32 %v303_v57, %v296_v58 }
  0xa1   : > { %v319_v2 = vand.u32 2147483647, %v318_v0 }
  0xa2   : > { %v312_v1 = vadd.f32 %v311_v63, %v304_v62 }
  0xa4   : > { %v320_v3 = vadd.f32 %v319_v2, %v312_v1 }
  0xc5   : > { %v259_v4 = vpop.f32.mrf.mxu0 }
  0xc6   : > { %v321_v5 = vadd.f32 %v320_v3, %v259_v4 }
  0xc8   : > { %322 = vst [vmem:[%s201_s28] sm:$0xff] %v321_v5 }
  0xc9   : > { %510 = shalt.err (!%p507_p3)
}
  0xca   : > { %423 = dma.vmem_to_hbm [thread:$0]  (%p617_p5), %s337_s29, 128, %s339_s30, %s324_s5  }
  0xcb PF: > { %p429_p4 = scmp.ge.s32.totalorder %s545_s18, 2  ;;  %s350_s12 = sand.u32 1, %s533_s15  }
  0xcc   : > { %s351_s13 = scalar_lea.sflag [#allocation3], %s350_s12 }
  0xcd   : > { %p426_p7 = pnand %p429_p4, %p621_p6 }
  0xcf   : > { %p427_p8 = pneg %p426_p7 }
  0xd1   : > { %528 = dma.done.wait (%p427_p8), %s351_s13, 128  }
  0xd2   : > { %530 = vsyncadd (%p427_p8), %s351_s13, 4294967168  ;;  %p14_p9 = scmp.ge.s32.totalorder %s604_s21, 4   ;;  %s680_s15 = smov %s537_s16 }
  0xd3   : > { %s681_s16 = smov %s541_s17  ;;  %s682_s17 = smov %s615_s24 }
  0xd4   : > { %s683_s18 = smov %s604_s21  ;;  %16 = sbr.rel (!%p14_p9) target bundleno = 3 (0x3), region = 74 }
  0xd9   :  { %357 = vsyncpa [#allocation3], 1 }
  0xda   :  { %359 = vsyncpa [#allocation3 + $0x1], 1 }

</bundles_post_ra>
